<compile_context>
chip_gen: v7x
topology: tpu7x:2x2x1
jax: 0.10.0
libtpu: 0.0.40
codegen_flags: <defaults>
</compile_context>

<pallas_src>
import jax
import jax.numpy as jnp
from jax import lax
from jax.experimental import pallas as pl
from jax.experimental.pallas import tpu as pltpu


# ------------------------------ tiling helpers ------------------------------

def _round_up(x, m):
    return ((x + m - 1) // m) * m


def _plan_dim(dim, target, align):
    """Return (block, padded_dim).

    Full-dim block (always legal) if the dim fits in `target`; otherwise an
    `align`-granular `target`-sized block with the dim padded up to a multiple
    of it (edges handled by pad-and-slice in the wrapper).
    """
    if dim <= target:
        return dim, dim
    blk = max((target // align) * align, align)
    return blk, _round_up(dim, blk)


def _q_tile(n, target):
    """Largest 8-granular divisor of n that is <= target, else full n."""
    if n <= target:
        return n
    t = (target // 8) * 8
    while t >= 8:
        if n % t == 0:
            return t
        t -= 8
    return n


# ------------------------------ linear kernels ------------------------------

def _matmul_kernel(x_ref, w_ref, o_ref, acc_ref):
    @pl.when(pl.program_id(2) == 0)
    def _():
        acc_ref[...] = jnp.zeros_like(acc_ref)

    acc_ref[...] += jnp.dot(x_ref[...], w_ref[...],
                            preferred_element_type=jnp.float32)

    @pl.when(pl.program_id(2) == pl.num_programs(2) - 1)
    def _():
        o_ref[...] = acc_ref[...].astype(o_ref.dtype)


def _matmul_bias_kernel(x_ref, w_ref, b_ref, o_ref, acc_ref):
    @pl.when(pl.program_id(2) == 0)
    def _():
        acc_ref[...] = jnp.zeros_like(acc_ref)

    acc_ref[...] += jnp.dot(x_ref[...], w_ref[...],
                            preferred_element_type=jnp.float32)

    @pl.when(pl.program_id(2) == pl.num_programs(2) - 1)
    def _():
        o_ref[...] = (acc_ref[...] + b_ref[...].astype(jnp.float32)
                      ).astype(o_ref.dtype)


def linear_pallas(x2d, w, b=None, *, tm=512, tn=512, tk=512):
    """y = x2d @ w (+ b); (M, N) tiles with a pipelined K reduction axis.

    Tiles are 512-wide (multiples of the 256x256 MXU cadence on v6e/v7x);
    ragged dims are padded up to the tile and the result is sliced back, so
    M = B*197-style shapes don't collapse to tiny MXU-starving blocks.
    """
    M, K = x2d.shape
    K2, N = w.shape
    assert K == K2

    btm, Mp = _plan_dim(M, tm, 256)
    btn, Np = _plan_dim(N, tn, 256)
    btk, Kp = _plan_dim(K, tk, 256)

    xp = x2d if (Mp, Kp) == (M, K) else jnp.pad(x2d, ((0, Mp - M), (0, Kp - K)))
    wp = w if (Kp, Np) == (K, N) else jnp.pad(w, ((0, Kp - K), (0, Np - N)))

    grid = (Mp // btm, Np // btn, Kp // btk)

    x_spec = pl.BlockSpec((btm, btk), lambda i, j, k: (i, k))
    w_spec = pl.BlockSpec((btk, btn), lambda i, j, k: (k, j))
    o_spec = pl.BlockSpec((btm, btn), lambda i, j, k: (i, j))

    itemsize = jnp.dtype(x2d.dtype).itemsize
    cost = pl.CostEstimate(
        flops=2 * M * K * N,
        transcendentals=0,
        bytes_accessed=(M * K + K * N + M * N) * itemsize,
    )
    params = pltpu.CompilerParams(
        dimension_semantics=("parallel", "parallel", "arbitrary"))

    if b is None:
        out = pl.pallas_call(
            _matmul_kernel,
            out_shape=jax.ShapeDtypeStruct((Mp, Np), x2d.dtype),
            grid=grid,
            in_specs=[x_spec, w_spec],
            out_specs=o_spec,
            scratch_shapes=[pltpu.VMEM((btm, btn), jnp.float32)],
            compiler_params=params,
            cost_estimate=cost,
        )(xp, wp)
    else:
        bp = b if Np == N else jnp.pad(b, (0, Np - N))
        b2d = bp.reshape(1, Np)
        b_spec = pl.BlockSpec((1, btn), lambda i, j, k: (0, j))
        out = pl.pallas_call(
            _matmul_bias_kernel,
            out_shape=jax.ShapeDtypeStruct((Mp, Np), x2d.dtype),
            grid=grid,
            in_specs=[x_spec, w_spec, b_spec],
            out_specs=o_spec,
            scratch_shapes=[pltpu.VMEM((btm, btn), jnp.float32)],
            compiler_params=params,
            cost_estimate=cost,
        )(xp, wp, b2d)

    if (Mp, Np) != (M, N):
        out = out[:M, :N]
    return out


# ---------------------------- attention core kernel ----------------------------

def _mha_heads(q_ref, q_off, k_ref, k_off, v_ref, v_off,
               heads, dim_head, acc_ref, o_ref):
    """Shared body: q rows (tq, ...) vs full-N k/v; writes one (tq, inner) block."""
    for h in range(heads):                                  # static unroll over heads
        lo = h * dim_head
        # Operands stay in the input dtype (bf16 -> bf16 MXU path); only the
        # accumulation is f32.  Softmax scale is already folded into the weight.
        q = q_ref[:, q_off + lo:q_off + lo + dim_head]      # (tq, dh)
        k = k_ref[:, k_off + lo:k_off + lo + dim_head]      # (N,  dh)
        v = v_ref[:, v_off + lo:v_off + lo + dim_head]      # (N,  dh)

        # QK^T: contract the last dims directly (no k transpose / relayout).
        dots = lax.dot_general(q, k, (((1,), (1,)), ((), ())),
                               preferred_element_type=jnp.float32)   # (tq, N)
        dots = dots - jnp.max(dots, axis=-1, keepdims=True)          # stable softmax
        p = jnp.exp(dots)
        inv_l = pl.reciprocal(jnp.sum(p, axis=-1, keepdims=True), approx=True)
        p = (p * inv_l).astype(v.dtype)

        # Per-head write into the f32 scratch bounds live ranges to one head.
        acc_ref[:, lo:lo + dim_head] = jnp.dot(
            p, v, preferred_element_type=jnp.float32)

    # Single lane-dense store of the merged 'n (h d)' block.
    o_ref[...] = acc_ref[...].astype(o_ref.dtype)


def attention_core_pallas(qkv, heads, dim_head, *, tq=256):
    """Multi-head softmax attention on the packed qkv buffer.

    qkv: (B, N, 3*inner) packed [q | k | v] along lanes (q already scaled).
    Returns (B, N, inner) in 'b n (h d)' layout, ready for the out projection.
    Grid is (B, N // tq): q rows are tiled, K/V stay resident per batch item.
    """
    B, N, three_inner = qkv.shape
    inner = heads * dim_head
    assert three_inner == 3 * inner

    btq = _q_tile(N, tq)
    # TODO(synk): ragged-N q tiles + kv-tiled online softmax (flash) for long N.
    grid = (B, N // btq)

    if inner % 128 == 0:
        # Lane-exact q/k/v slices out of the packed buffer (no over-fetch).
        in_specs = [
            pl.BlockSpec((None, btq, inner), lambda b, qi: (b, qi, 0)),
            pl.BlockSpec((None, N, inner), lambda b, qi: (b, 0, 1)),
            pl.BlockSpec((None, N, inner), lambda b, qi: (b, 0, 2)),
        ]
        operands = (qkv, qkv, qkv)

        def kernel(q_ref, k_ref, v_ref, o_ref, acc_ref):
            _mha_heads(q_ref, 0, k_ref, 0, v_ref, 0,
                       heads, dim_head, acc_ref, o_ref)
    else:
        # Packed fallback when inner is not 128-lane aligned.
        in_specs = [
            pl.BlockSpec((None, btq, 3 * inner), lambda b, qi: (b, qi, 0)),
            pl.BlockSpec((None, N, 3 * inner), lambda b, qi: (b, 0, 0)),
        ]
        operands = (qkv, qkv)

        def kernel(qrows_ref, kv_ref, o_ref, acc_ref):
            _mha_heads(qrows_ref, 0, kv_ref, inner, kv_ref, 2 * inner,
                       heads, dim_head, acc_ref, o_ref)

    out_spec = pl.BlockSpec((None, btq, inner), lambda b, qi: (b, qi, 0))

    itemsize = jnp.dtype(qkv.dtype).itemsize
    cost = pl.CostEstimate(
        flops=4 * B * heads * N * N * dim_head,
        transcendentals=B * heads * N * N,
        bytes_accessed=(B * N * 3 * inner + B * N * inner) * itemsize,
    )

    return pl.pallas_call(
        kernel,
        out_shape=jax.ShapeDtypeStruct((B, N, inner), qkv.dtype),
        grid=grid,
        in_specs=in_specs,
        out_specs=out_spec,
        scratch_shapes=[pltpu.VMEM((btq, inner), jnp.float32)],
        compiler_params=pltpu.CompilerParams(
            dimension_semantics=("parallel", "parallel"),
            # Raise the scoped VMEM limit (v5e defaults to 16 MiB); actual use
            # here is far below every generation's physical VMEM.
            vmem_limit_bytes=64 * 1024 * 1024),
        cost_estimate=cost,
    )(*operands)


# ------------------------------- module glue -------------------------------

def attention_forward(x, params, heads, dim_head):
    """Forward pass equivalent to Attention.forward(x) (tensor-input branch)."""
    B, N, D = x.shape
    inner = heads * dim_head
    scale = dim_head ** -0.5

    # Fold the softmax scale into the q columns of the qkv projection weight:
    # one tiny op per call, removes per-head scale multiplies in the kernel and
    # keeps the scale ahead of any bf16 operand cast.
    w_qkv = params["w_qkv"]
    w_qkv = jnp.concatenate([w_qkv[:, :inner] * scale, w_qkv[:, inner:]], axis=-1)

    # qkv projection (tiled Pallas matmul)
    qkv = linear_pallas(x.reshape(B * N, D), w_qkv)                 # (B*N, 3*inner)
    qkv = qkv.reshape(B, N, 3 * inner)

    # attention hot path: head split/merge fused into the kernel, output is
    # already 'b n (h d)' so it feeds the out-projection directly.
    out = attention_core_pallas(qkv, heads, dim_head)               # (B, N, inner)

    # to_out projection (project_out=True since heads != 1); dropout p=0.0 -> identity
    out = linear_pallas(out.reshape(B * N, inner), params["w_out"], params["b_out"])
    return out.reshape(B, N, D)


def init_params(key, dim, heads, dim_head):
    inner = heads * dim_head
    k1, k2, k3 = jax.random.split(key, 3)
    # Stored as (in, out); equivalent to PyTorch weight.T.
    return {
        "w_qkv": jax.random.normal(k1, (dim, 3 * inner), jnp.float32) * 0.02,
        "w_out": jax.random.normal(k2, (inner, dim), jnp.float32) * 0.02,
        "b_out": jax.random.normal(k3, (dim,), jnp.float32) * 0.02,
    }


def attention_reference(x, params, heads, dim_head):
    """Pure-JAX reference for correctness checking."""
    B, N, D = x.shape
    inner = heads * dim_head
    scale = dim_head ** -0.5
    qkv = x @ params["w_qkv"]
    q, k, v = jnp.split(qkv, 3, axis=-1)
    rs = lambda t: t.reshape(B, N, heads, dim_head).transpose(0, 2, 1, 3)
    q, k, v = rs(q), rs(k), rs(v)
    dots = jnp.einsum("bhid,bhjd->bhij", q, k) * scale
    attn = jax.nn.softmax(dots, axis=-1)
    out = jnp.einsum("bhij,bhjd->bhid", attn, v)
    out = out.transpose(0, 2, 1, 3).reshape(B, N, inner)
    return out @ params["w_out"] + params["b_out"]


if __name__ == "__main__":
    # Small shapes consistent with the module; inner = heads*dim_head = 128 is
    # lane-aligned so the attention kernel takes the exact q/k/v-slicing path.
    B, N, DIM = 2, 16, 64
    HEADS, DIM_HEAD = 4, 32

    key = jax.random.PRNGKey(0)
    kx, kp = jax.random.split(key)
    x = jax.random.normal(kx, (B, N, DIM), jnp.float32)
    params = init_params(kp, DIM, HEADS, DIM_HEAD)

    out = attention_forward(x, params, HEADS, DIM_HEAD)
    out = jax.block_until_ready(out)

    ref = attention_reference(x, params, HEADS, DIM_HEAD)
    assert out.shape == (B, N, DIM)
    # Tolerance relaxed slightly vs f32-exact because the softmax normalization
    # uses the EUP approximate reciprocal (pl.reciprocal(approx=True)).
    assert jnp.allclose(out, ref, atol=1e-4, rtol=1e-3), "mismatch vs JAX reference"

    print("KERNEL_OK")
</pallas_src>

<mosaic_0001>
module attributes {stable_mosaic.version = 11 : i64} {
  func.func @_matmul_kernel(%arg0: i32, %arg1: i32, %arg2: i32, %arg3: memref<32x64xf32, #tpu.memory_space<vmem>>, %arg4: memref<64x384xf32, #tpu.memory_space<vmem>>, %arg5: memref<32x384xf32, #tpu.memory_space<vmem>>, %arg6: memref<32x384xf32, #tpu.memory_space<vmem>>) attributes {dimension_semantics = [#tpu.dimension_semantics<parallel>, #tpu.dimension_semantics<parallel>, #tpu.dimension_semantics<arbitrary>], iteration_bounds = array<i64: 1, 1, 1>, scalar_prefetch = 0 : i64, scratch_operands = 1 : i64, tpu.core_type = #tpu.core_type<tc>, window_params = [{transform_indices = @transform_0, window_bounds = array<i64: 32, 64>}, {transform_indices = @transform_1, window_bounds = array<i64: 64, 384>}, {transform_indices = @transform_2, window_bounds = array<i64: 32, 384>}]} {
    %c0_i32 = arith.constant 0 : i32
    %0 = arith.cmpi eq, %arg2, %c0_i32 : i32
    %1 = arith.extui %0 : i1 to i32
    %c0_i32_0 = arith.constant 0 : i32
    %2 = arith.cmpi ne, %1, %c0_i32_0 : i32
    scf.if %2 {
      %cst_10 = arith.constant 0.000000e+00 : f32
      %12 = vector.broadcast %cst_10 : f32 to vector<32x384xf32>
      %c0_11 = arith.constant 0 : index
      %c0_12 = arith.constant 0 : index
      %13 = vector.load %arg6[%c0_11, %c0_12] : memref<32x384xf32, #tpu.memory_space<vmem>>, vector<32x384xf32>
      tpu.vector_store %arg6[%c0_11, %c0_12], %12 {strides = array<i32>} : memref<32x384xf32, #tpu.memory_space<vmem>>, vector<32x384xf32>,
    } else {
    }
    %c0 = arith.constant 0 : index
    %c0_1 = arith.constant 0 : index
    %3 = vector.load %arg6[%c0, %c0_1] : memref<32x384xf32, #tpu.memory_space<vmem>>, vector<32x384xf32>
    %c0_2 = arith.constant 0 : index
    %c0_3 = arith.constant 0 : index
    %4 = vector.load %arg3[%c0_2, %c0_3] : memref<32x64xf32, #tpu.memory_space<vmem>>, vector<32x64xf32>
    %c0_4 = arith.constant 0 : index
    %c0_5 = arith.constant 0 : index
    %5 = vector.load %arg4[%c0_4, %c0_5] : memref<64x384xf32, #tpu.memory_space<vmem>>, vector<64x384xf32>
    %cst = arith.constant dense<0.000000e+00> : vector<32x384xf32>
    %6 = tpu.matmul %4, %5, %cst {dimension_numbers = #tpu.dot_dimension_numbers<[1], [0], [0], [1], [0, 0, 1, 1], [], []>} : vector<32x64xf32>, vector<64x384xf32>, vector<32x384xf32> -> vector<32x384xf32>
    %7 = arith.addf %3, %6 : vector<32x384xf32>
    %c0_6 = arith.constant 0 : index
    %c0_7 = arith.constant 0 : index
    %8 = vector.load %arg6[%c0_6, %c0_7] : memref<32x384xf32, #tpu.memory_space<vmem>>, vector<32x384xf32>
    tpu.vector_store %arg6[%c0_6, %c0_7], %7 {strides = array<i32>} : memref<32x384xf32, #tpu.memory_space<vmem>>, vector<32x384xf32>,
    %c0_i32_8 = arith.constant 0 : i32
    %9 = arith.cmpi eq, %arg2, %c0_i32_8 : i32
    %10 = arith.extui %9 : i1 to i32
    %c0_i32_9 = arith.constant 0 : i32
    %11 = arith.cmpi ne, %10, %c0_i32_9 : i32
    scf.if %11 {
      %c0_10 = arith.constant 0 : index
      %c0_11 = arith.constant 0 : index
      %12 = vector.load %arg6[%c0_10, %c0_11] : memref<32x384xf32, #tpu.memory_space<vmem>>, vector<32x384xf32>
      %c0_12 = arith.constant 0 : index
      %c0_13 = arith.constant 0 : index
      %13 = vector.load %arg5[%c0_12, %c0_13] : memref<32x384xf32, #tpu.memory_space<vmem>>, vector<32x384xf32>
      tpu.vector_store %arg5[%c0_12, %c0_13], %12 {strides = array<i32>} : memref<32x384xf32, #tpu.memory_space<vmem>>, vector<32x384xf32>,
    } else {
    }
    return
  }
  func.func @transform_0(%arg0: i32, %arg1: i32, %arg2: i32) -> (i32, i32) {
    %c0_i32 = arith.constant 0 : i32
    return %arg0, %arg2 : i32, i32
  }
  func.func @transform_1(%arg0: i32, %arg1: i32, %arg2: i32) -> (i32, i32) {
    %c0_i32 = arith.constant 0 : i32
    return %arg2, %arg1 : i32, i32
  }
  func.func @transform_2(%arg0: i32, %arg1: i32, %arg2: i32) -> (i32, i32) {
    %c0_i32 = arith.constant 0 : i32
    return %arg0, %arg1 : i32, i32
  }
}

</mosaic_0001>

<bundles_post_ra>
// kernel: tpu_custom_call.1
= control target key start
LH: loop header
LB: loop body
LE: loop exit
PB: predicated region body
PF: predicated region fallthrough
CT: control target
= control target key end

     0   :  { %7 = vsyncpa [#allocation4], 0  ;;  %s583_s0 = inlined_call_operand.hbm [shape: f32[32,64], index: 0, kind: input, shape index: {}]   ;;  %s584_s1 = inlined_call_operand.hbm [shape: f32[64,384], index: 1, kind: input, shape index: {}]   ;;  %s585_s2 = inlined_call_operand.hbm [shape: f32[32,384], index: 2, kind: output, shape index: {}]  }
   0x1   :  { %8 = vsyncpa [#allocation7], 0 }
   0x2   :  { %9 = vsyncpa [#allocation5], 0  ;;  %s506_s9 = smov [#allocation3]   ;;  %s434_s13 = scalar_lea.hbm %s583_s0, 512 }
   0x3   :  { %s15_s10 = sshll.u32 %s506_s9, 4  ;;  %p435_p0 = scmp.ne.s32.totalorder %s583_s0, %s434_s13  ;;  %s16_s10 = int_to_ptr.vmem [resolvable:$true] %s15_s10 }
   0x4   :  { %p438_p1 = scmp.lt.u32.totalorder %s434_s13, %s583_s0 }
   0x6   :  { %p440_p2 = pnand %p438_p1, %p435_p0 }
   0x8   :  { %443 = shalt.err (!%p440_p2)
}
   0x9   :  { %s444_s18 = scalar_lea.vmem %s16_s10, 512  ;;  %p449_p4 = scmp.lt.s32.totalorder %s16_s10, %s16_s10 }
   0xa   :  { %p445_p3 = scmp.ne.s32.totalorder %s16_s10, %s444_s18  ;;  %p450_p5 = scmp.lt.s32.totalorder %s444_s18, %s444_s18 }
   0xc   :  { %p451_p6 = por %p450_p5, %p449_p4 }
   0xe   :  { %p452_p7 = pnand %p451_p6, %p445_p3 }
  0x10   :  { %455 = shalt.err (!%p452_p7)
}
  0x11   :  { %s507_s19 = smov 128   ;;  %s508_s20 = smov 8  }
  0x12   :  { %21 = dma.hbm_to_vmem [thread:$0]  %s583_s0, 512, %s16_s10, [#allocation4], %s507_s19, %s507_s19, %s508_s20  }
  0x13   :  { %s509_s23 = smov [#allocation6]   ;;  %s456_s27 = scalar_lea.hbm %s584_s1, 3072 }
  0x14   :  { %s27_s24 = sshll.u32 %s509_s23, 4  ;;  %p457_p8 = scmp.ne.s32.totalorder %s584_s1, %s456_s27  ;;  %s28_s24 = int_to_ptr.vmem [resolvable:$true] %s27_s24 }
  0x15   :  { %p460_p9 = scmp.lt.u32.totalorder %s456_s27, %s584_s1 }
  0x17   :  { %p462_p10 = pnand %p460_p9, %p457_p8 }
  0x19   :  { %465 = shalt.err (!%p462_p10)
}
  0x1a   :  { %s466_s4 = scalar_lea.vmem %s28_s24, 3072  ;;  %p471_p12 = scmp.lt.s32.totalorder %s28_s24, %s28_s24 }
  0x1b   :  { %p467_p11 = scmp.ne.s32.totalorder %s28_s24, %s466_s4  ;;  %p472_p13 = scmp.lt.s32.totalorder %s466_s4, %s466_s4 }
  0x1d   :  { %p473_p0 = por %p472_p13, %p471_p12 }
  0x1f   :  { %p474_p1 = pnand %p473_p0, %p467_p11 }
  0x21   :  { %477 = shalt.err (!%p474_p1)
}
  0x22   :  { %s510_s0 = smov 384   ;;  %s511_s5 = smov 24  }
  0x23   :  { %33 = dma.hbm_to_vmem [thread:$0]  %s584_s1, 3072, %s28_s24, [#allocation7], %s510_s0, %s510_s0, %s511_s5  }
  0x24   :  { %500 = dma.done.wait [#allocation4], 512  }
  0x25   :  { %501 = vsyncadd [#allocation4], 4294966784 }
  0x26   :  { %502 = dma.done.wait [#allocation7], 3072  }
  0x27   :  { %503 = vsyncadd [#allocation7], 4294964224  ;;  %v512_v0 = vmov 0.0   ;;  %v73_v1 = vld [vmem:[#allocation6 + $0x8] sm:$0xff]  ;;  %v76_v2 = vld [vmem:[#allocation6 + $0x20] sm:$0xff]  ;;  %vm96_vm0 = vcmask 523264  }
  0x28   :  { %173 = vmatprep.mubr.f32.mxu0 %v512_v0  ;;  %v72_v3 = vld [vmem:[#allocation6] sm:$0xff]  ;;  %v394_v4 = vpack.c.bf16 %v76_v2, %v73_v1  ;;  %v75_v5 = vld [vmem:[#allocation6 + $0x18] sm:$0xff]  ;;  %v82_v7 = vld [vmem:[#allocation6 + $0x50] sm:$0xff]  ;;  %s513_s1 = smov [#allocation8]  }
  0x29   :  { %v79_v6 = vld [vmem:[#allocation6 + $0x38] sm:$0xff]  ;;  %v396_v8 = vpack.c.bf16 %v75_v5, %v72_v3  ;;  %v78_v10 = vld [vmem:[#allocation6 + $0x30] sm:$0xff]  ;;  %v81_v11 = vld [vmem:[#allocation6 + $0x48] sm:$0xff]  ;;  %s339_s8 = sshll.u32 %s513_s1, 4  ;;  %s340_s8 = int_to_ptr.vmem [resolvable:$true] %s339_s8 }
  0x2a   :  { %v398_v9 = vpack.c.bf16 %v82_v7, %v79_v6  ;;  %v74_v12 = vld [vmem:[#allocation6 + $0x10] sm:$0xff]  ;;  %395 = vmatprep.subr.bf16.mxu0 %v394_v4  ;;  %v77_v13 = vld [vmem:[#allocation6 + $0x28] sm:$0xff]  ;;  %v88_v15 = vld [vmem:[#allocation6 + $0x80] sm:$0xff]  ;;  %v400_v16 = vpack.c.bf16 %v81_v11, %v78_v10  ;;  %s478_s9 = scalar_lea.vmem %s340_s8, 1536  ;;  %p483_p3 = scmp.lt.s32.totalorder %s340_s8, %s340_s8 }
  0x2b   :  { %v85_v14 = vld [vmem:[#allocation6 + $0x68] sm:$0xff]  ;;  %397 = vmatpush1.bf16.msra.mxu0 %v396_v8  ;;  %v410_v17 = vpack.c.bf16 %v77_v13, %v74_v12  ;;  %v80_v18 = vld [vmem:[#allocation6 + $0x40] sm:$0xff]  ;;  %v87_v21 = vld [vmem:[#allocation6 + $0x78] sm:$0xff]  ;;  %p479_p2 = scmp.ne.s32.totalorder %s340_s8, %s478_s9  ;;  %p484_p4 = scmp.lt.s32.totalorder %s478_s9, %s478_s9 }
  0x2c   :  { %399 = vmatprep.subr.bf16.mxu0 %v398_v9  ;;  %v402_v19 = vpack.c.bf16 %v88_v15, %v85_v14  ;;  %v84_v20 = vld [vmem:[#allocation6 + $0x60] sm:$0xff]  ;;  %v83_v22 = vld [vmem:[#allocation6 + $0x58] sm:$0xff]  ;;  %v94_v25 = vld [vmem:[#allocation6 + $0xb0] sm:$0xff] }
  0x2d   :  { %411 = vmatprep.subr.bf16.mxu1 %v410_v17  ;;  %v414_v23 = vpack.c.bf16 %v83_v22, %v80_v18  ;;  %v91_v24 = vld [vmem:[#allocation6 + $0x98] sm:$0xff]  ;;  %v86_v26 = vld [vmem:[#allocation6 + $0x70] sm:$0xff]  ;;  %v89_v27 = vld [vmem:[#allocation6 + $0x88] sm:$0xff]  ;;  %v404_v28 = vpack.c.bf16 %v87_v21, %v84_v20  ;;  %p485_p5 = por %p484_p4, %p483_p3 }
  0x2e   :  { %413 = vmatpush3.bf16.msra.mxu1 %v410_v17  ;;  %v90_v29 = vld [vmem:[#allocation6 + $0x90] sm:$0xff]  ;;  %v418_v30 = vpack.c.bf16 %v89_v27, %v86_v26  ;;  %v68_v31 = vld [vmem:[#allocation3] sm:$0xff]  ;;  %v406_v32 = vpack.c.bf16 %v94_v25, %v91_v24  ;;  %v93_v33 = vld [vmem:[#allocation6 + $0xa8] sm:$0xff] }
  0x2f   :  { %401 = vmatpush1.bf16.msra.mxu0 %v400_v16  ;;  %415 = vmatprep.subr.bf16.mxu1 %v414_v23  ;;  %v92_v34 = vld [vmem:[#allocation6 + $0xa0] sm:$0xff]  ;;  %v95_v35 = vld [vmem:[#allocation6 + $0xb8] sm:$0xff]  ;;  %v408_v36 = vpack.c.bf16 %v93_v33, %v90_v29  ;;  %v69_v38 = vld [vmem:[#allocation3 + $0x8] sm:$0xff]  ;;  %p486_p6 = pnand %p485_p5, %p479_p2 }
  0x30   :  { %403 = vmatprep.subr.bf16.mxu0 %v402_v19  ;;  %388 = vmatprep.mubr.msk.f32.mxu1 %vm96_vm0, %v68_v31  ;;  %v422_v37 = vpack.c.bf16 %v95_v35, %v92_v34  ;;  %v70_v39 = vld [vmem:[#allocation3 + $0x10] sm:$0xff]  ;;  %v71_v40 = vld [vmem:[#allocation3 + $0x18] sm:$0xff] }
  0x32   :  { %417 = vmatpush3.bf16.msra.mxu1 %v414_v23 }
  0x33   :  { %405 = vmatpush1.bf16.msra.mxu0 %v404_v28  ;;  %419 = vmatprep.subr.bf16.mxu1 %v418_v30 }
  0x34   :  { %407 = vmatprep.subr.bf16.mxu0 %v406_v32 }
  0x36   :  { %421 = vmatpush3.bf16.msra.mxu1 %v418_v30 }
  0x37   :  { %409 = vmatpush1.bf16.msra.mxu0 %v408_v36  ;;  %423 = vmatprep.subr.bf16.mxu1 %v422_v37 }
  0x3a   :  { %352 = vmatmul.mubr.msk.f32.vlgmr.msra.gmra.mrb[0].mxu0 %vm96_vm0, %v68_v31  ;;  %425 = vmatpush3.bf16.msra.mxu1 %v422_v37 }
  0x3b   :  { %179 = vmatprep.mubr.f32.mxu0 %v512_v0 }
  0x3d   :  { %389 = vmatmul.mubr.msk.f32.vlgmr.msra.gmra.mrb[0].mxu1 %vm96_vm0, %v69_v38 }
  0x3e   :  { %353 = vmatmul.mubr.msk.f32.gmra.mrb[2].mxu0 %vm96_vm0, %v69_v38  ;;  %391 = vmatprep.mubr.msk.f32.mxu1 %vm96_vm0, %v70_v39 }
  0x3f   :  { %185 = vmatprep.mubr.f32.mxu0 %v512_v0 }
  0x41   :  { %392 = vmatmul.mubr.msk.f32.gmra.mrb[2].mxu1 %vm96_vm0, %v71_v40 }
  0x42   :  { %354 = vmatmul.mubr.msk.f32.gmra.mrb[4].mxu0 %vm96_vm0, %v70_v39 }
  0x43   :  { %191 = vmatprep.mubr.f32.mxu0 %v512_v0 }
  0x46   :  { %355 = vmatmul.mubr.msk.f32.gmra.mrb[6].mxu0 %vm96_vm0, %v71_v40 }
 0x10d   :  { %v175_v41 = vpop.f32.mrb[0].mxu0 }
 0x10e   :  { %322 = vst [vmem:[#allocation8] sm:$0xff] %v175_v41  ;;  %v177_v42 = vpop.f32.mrb[1].mxu0 }
 0x10f   :  { %323 = vst [vmem:[#allocation8 + $0x8] sm:$0xff] %v177_v42 }
 0x110   :  { %v390_v43 = vpop.f32.mrb[0].mxu1 }
 0x111   :  { %v181_v44 = vpop.f32.mrb[2].mxu0  ;;  %327 = vst [vmem:[#allocation8 + $0x28] sm:$0xff] %v390_v43  ;;  %v264_v45 = vpop.f32.mrb[1].mxu1 }
 0x112   :  { %325 = vst [vmem:[#allocation8 + $0x18] sm:$0xff] %v181_v44  ;;  %v183_v46 = vpop.f32.mrb[3].mxu0  ;;  %324 = vst [vmem:[#allocation8 + $0x10] sm:$0xff] %v264_v45 }
 0x113   :  { %326 = vst [vmem:[#allocation8 + $0x20] sm:$0xff] %v183_v46 }
 0x114   :  { %v393_v47 = vpop.f32.mrb[2].mxu1 }
 0x115   :  { %v187_v48 = vpop.f32.mrb[4].mxu0  ;;  %333 = vst [vmem:[#allocation8 + $0x58] sm:$0xff] %v393_v47  ;;  %v274_v49 = vpop.f32.mrb[3].mxu1 }
 0x116   :  { %328 = vst [vmem:[#allocation8 + $0x30] sm:$0xff] %v187_v48  ;;  %v189_v50 = vpop.f32.mrb[5].mxu0  ;;  %330 = vst [vmem:[#allocation8 + $0x40] sm:$0xff] %v274_v49 }
 0x117   :  { %329 = vst [vmem:[#allocation8 + $0x38] sm:$0xff] %v189_v50 }
 0x119   :  { %v193_v51 = vpop.f32.mrb[6].mxu0 }
 0x11a   :  { %331 = vst [vmem:[#allocation8 + $0x48] sm:$0xff] %v193_v51  ;;  %v195_v52 = vpop.f32.mrb[7].mxu0 }
 0x11b   :  { %332 = vst [vmem:[#allocation8 + $0x50] sm:$0xff] %v195_v52 }
 0x11c   :  { %489 = shalt.err (!%p486_p6)
}
 0x11d   :  { %s490_s12 = scalar_lea.hbm %s585_s2, 1536 }
 0x11e   :  { %p491_p7 = scmp.ne.s32.totalorder %s585_s2, %s490_s12  ;;  %p494_p8 = scmp.lt.u32.totalorder %s490_s12, %s585_s2 }
 0x120   :  { %p496_p9 = pnand %p494_p8, %p491_p7 }
 0x122   :  { %499 = shalt.err (!%p496_p9)
}
 0x123   :  { %345 = dma.vmem_to_hbm [thread:$0]  %s340_s8, 1536, %s585_s2, [#allocation5], %s510_s0, %s510_s0, %s511_s5  }
 0x124   :  { %504 = dma.done.wait [#allocation5], 1536  }
 0x125   :  { %505 = vsyncadd [#allocation5], 4294965760 }
 0x126   :  { %349 = vsyncpa [#allocation4], 1 }
 0x127   :  { %350 = vsyncpa [#allocation7], 1 }
 0x128   :  { %351 = vsyncpa [#allocation5], 1 }

</bundles_post_ra>
